<compile_context>
chip_gen: v5e
topology: v5e:2x2
jax: 0.10.0
libtpu: 0.0.40
codegen_flags: <defaults>
</compile_context>

<pallas_src>
from math import log

import jax
import jax.numpy as jnp
from jax import lax
from jax.experimental import pallas as pl
from jax.experimental.pallas import tpu as pltpu


_LANE = 128
_ROW_BLOCK_BYTES = 512 * 1024        # cap on a single row-block f32 slab
_TIME_CHUNK_BYTES = 3 * 512 * 1024   # ~1.5 MiB target per-grid-step current transfer
_MAX_TIME_CHUNK = 32                 # keeps the unrolled inner loop a reasonable size


# ---------------------------------------------------------------------------
# layout helpers
# ---------------------------------------------------------------------------
def _choose_layout(n):
    """Lane-dense 2D layout (rows, lanes) for n flattened elements. lanes is a multiple
    of 128; prefer an exact factorization with >= 8 rows (full vreg sublane occupancy),
    otherwise fall back to lanes=128 with zero padding up to rows*lanes."""
    best = None
    best_any = None
    w = _LANE
    while w <= n:
        if n % w == 0:
            best_any = w
            if n // w >= 8:
                best = w
        w += _LANE
    if best is not None:
        lanes = best
    elif best_any is not None:
        lanes = best_any
    else:
        lanes = _LANE
    rows = -(-n // lanes)
    return rows, lanes


def _choose_block_rows(rows, lanes):
    """Largest divisor of rows that (a) is a multiple of 16 (bf16 sublane tiling for the
    spike output), (b) leaves >= 2 row blocks so the 'parallel' grid axis can shard
    across v7x's two TensorCores, and (c) keeps a single-block f32 slab under
    _ROW_BLOCK_BYTES. Falls back to the full extent (always a legal block shape)."""
    if rows < 32 or rows % 16 != 0:
        return rows
    cap = min(rows // 2, max(16, _ROW_BLOCK_BYTES // (lanes * 4)))
    best = None
    r = 16
    while r <= cap:
        if rows % r == 0:
            best = r
        r += 16
    return best if best is not None else rows


def _choose_time_chunk(T, step_bytes):
    """Largest divisor of T such that Tc * step_bytes stays near the DMA sweet spot."""
    cap = max(1, min(_MAX_TIME_CHUNK, _TIME_CHUNK_BYTES // max(step_bytes, 1)))
    best = 1
    t = 1
    limit = min(cap, T)
    while t <= limit:
        if T % t == 0:
            best = t
        t += 1
    return best


# ---------------------------------------------------------------------------
# kernel
# ---------------------------------------------------------------------------
def _make_lif_kernel(Tc, threshold, vrest, r, v_peak, emit_vtmp):
    def kernel(cur_ref, alpha_ref, vinit_ref, spike_ref, vout_ref, *rest):
        tchunk = pl.program_id(1)

        # Membrane-voltage accumulator = the v-output block; same block index for every
        # time chunk, so it stays resident in VMEM across the whole time axis.
        @pl.when(tchunk == 0)
        def _():
            vout_ref[...] = vinit_ref[...]

        alpha = alpha_ref[...]                       # (block_r, lanes), dt / tau

        def step(t, v):
            cur = cur_ref[t]                         # (block_r, lanes)
            drive = cur if r == 1.0 else r * cur
            leak = -v if vrest == 0.0 else (vrest - v)
            v_new = v + alpha * (leak + drive)
            spike_b = v_new > threshold              # bool; cast only for the store
            spike_ref[t] = spike_b.astype(spike_ref.dtype)
            if emit_vtmp:
                rest[0][t] = jnp.where(spike_b, v_peak, v_new)
            return jnp.where(spike_b, 0.0, v_new)    # reset_mechanism == 'zero'

        vout_ref[...] = lax.fori_loop(0, Tc, step, vout_ref[...], unroll=True)

    return kernel


# ---------------------------------------------------------------------------
# fused multi-timestep forward builder
# ---------------------------------------------------------------------------
def build_lif_sequence(T, B, F, *, dt, min_tau, threshold, vrest, r, v_peak,
                       emit_vtmp=False):
    """Returns a jitted fn(currents[T,B,F], v[B,F], w[F]) -> (spikes[T,B,F] (bf16, exact
    0/1), v_final[B,F]) plus v_tmp[T,B,F] (f32) when emit_vtmp."""
    N = B * F
    rows, lanes = _choose_layout(N)
    padded = rows * lanes
    block_r = _choose_block_rows(rows, lanes)
    nb = rows // block_r
    Tc = _choose_time_chunk(T, block_r * lanes * 4)
    n_tc = T // Tc

    kernel = _make_lif_kernel(Tc, threshold, vrest, r, v_peak, emit_vtmp)

    seq_spec = pl.BlockSpec((Tc, block_r, lanes), lambda b, t: (t, b, 0))
    res_spec = pl.BlockSpec((block_r, lanes), lambda b, t: (b, 0))

    out_shape = [
        jax.ShapeDtypeStruct((T, rows, lanes), jnp.bfloat16),   # spikes (exact 0/1)
        jax.ShapeDtypeStruct((rows, lanes), jnp.float32),       # final membrane voltage
    ]
    out_specs = [seq_spec, res_spec]
    if emit_vtmp:
        out_shape.append(jax.ShapeDtypeStruct((T, rows, lanes), jnp.float32))
        out_specs.append(seq_spec)

    elems = T * padded
    bytes_accessed = 4 * elems + 2 * elems + 3 * 4 * padded     # cur in + spikes out + alpha/v in/out
    flops = 6 * elems
    if emit_vtmp:
        bytes_accessed += 4 * elems
        flops += elems
    cost = pl.CostEstimate(flops=flops, transcendentals=0, bytes_accessed=bytes_accessed)

    call = pl.pallas_call(
        kernel,
        out_shape=tuple(out_shape),
        grid_spec=pltpu.PrefetchScalarGridSpec(
            num_scalar_prefetch=0,
            grid=(nb, n_tc),                 # time-chunk axis LAST: v resident per row block
            in_specs=[seq_spec, res_spec, res_spec],
            out_specs=out_specs,
        ),
        # initial voltage (input 2) aliases final voltage (output 1): in-place state.
        input_output_aliases={2: 1},
        compiler_params=pltpu.CompilerParams(
            dimension_semantics=("parallel", "arbitrary")),
        cost_estimate=cost,
    )

    def fn(currents, v, w):
        # alpha = dt / tau, computed once per call (the only transcendental; stays in XLA).
        alpha = (dt / (min_tau + jax.nn.sigmoid(w.astype(jnp.float32)))).astype(jnp.float32)
        alpha_full = jnp.broadcast_to(alpha[None, :], (B, F)).reshape(N)
        cur = currents.astype(jnp.float32).reshape(T, N)
        v0 = v.astype(jnp.float32).reshape(N)
        if padded != N:
            pad = padded - N
            alpha_full = jnp.pad(alpha_full, (0, pad))
            cur = jnp.pad(cur, ((0, 0), (0, pad)))
            v0 = jnp.pad(v0, (0, pad))
        alpha_full = alpha_full.reshape(rows, lanes)
        cur = cur.reshape(T, rows, lanes)
        v0 = v0.reshape(rows, lanes)

        outs = call(cur, alpha_full, v0)
        spikes = outs[0].reshape(T, padded)[:, :N].reshape(T, B, F)
        v_final = outs[1].reshape(padded)[:N].reshape(B, F)
        if emit_vtmp:
            v_tmp = outs[2].reshape(T, padded)[:, :N].reshape(T, B, F)
            return spikes, v_final, v_tmp
        return spikes, v_final

    return jax.jit(fn)


# ---------------------------------------------------------------------------
# module wrapper
# ---------------------------------------------------------------------------
class LIFPallas:
    """JAX/Pallas port of the PyTorch LIF module (zero-reset, reset_v=True).
    Spikes are returned in bfloat16 (values are exactly 0.0/1.0)."""

    def __init__(self, in_size, dt, init_tau=0.5, min_tau=0.1, threshold=1.0,
                 vrest=0.0, output=False):
        self.in_size = tuple(in_size)
        self.dt = float(dt)
        self.min_tau = float(min_tau)
        self.threshold = float(threshold)
        self.vrest = float(vrest)
        self.output = output
        self.r = 1.0
        self.v_peak = self.threshold * 3.0
        init_w = -log(1.0 / (init_tau - min_tau) - 1.0)
        F = 1
        for d in self.in_size:
            F *= d
        self.F = F
        self.w = jnp.full((F,), init_w, dtype=jnp.float32)  # matches init_w * ones(in_size)
        self.v = None
        self._fns = {}

    def _get_fn(self, T, B):
        key = (T, B)
        if key not in self._fns:
            self._fns[key] = build_lif_sequence(
                T, B, self.F, dt=self.dt, min_tau=self.min_tau,
                threshold=self.threshold, vrest=self.vrest, r=self.r,
                v_peak=self.v_peak, emit_vtmp=self.output)
        return self._fns[key]

    def init_voltage(self):
        self.v = None

    def forward_sequence(self, currents):
        """currents: [T, B, *in_size]. Runs all T timesteps in ONE fused kernel call."""
        T, B = currents.shape[0], currents.shape[1]
        cur = currents.reshape(T, B, self.F)
        if self.v is None:
            self.v = jnp.zeros((B, self.F), dtype=jnp.float32)
        fn = self._get_fn(T, B)
        shp = (T, B) + self.in_size
        if self.output:
            spikes, v_final, v_tmp = fn(cur, self.v, self.w)
            self.v = v_final
            return spikes.reshape(shp), v_tmp.reshape(shp)
        spikes, v_final = fn(cur, self.v, self.w)
        self.v = v_final
        return spikes.reshape(shp)

    def __call__(self, current):
        """Single-step forward (PyTorch-compatible signature): current [B, *in_size]."""
        out = self.forward_sequence(current[None])
        if self.output:
            return out[0][0], out[1][0]
        return out[0]


# ---------------------------------------------------------------------------
# pure-JAX reference (matches PyTorch math exactly)
# ---------------------------------------------------------------------------
def _reference_step(current, v, w, dt, min_tau, threshold, vrest, r):
    tau = min_tau + jax.nn.sigmoid(w)[None, :]
    v_new = v + dt / tau * (-(v - vrest) + r * current)
    spike = (v_new - threshold > 0).astype(jnp.float32)
    v_tmp = v_new * (1 - spike) + 3.0 * threshold * spike
    v_reset = v_new * (1 - spike)
    return spike, v_tmp, v_reset


if __name__ == "__main__":
    key0 = jax.random.PRNGKey(0)
    key1, key2 = jax.random.split(key0)
    ok = True
    dt = 0.01

    # --- test 1: main shape, output=False (spike-only fast path) ------------
    B, C, H, W = 2, 4, 16, 16            # in_size = (C, H, W), F = 1024
    T = 8
    lif = LIFPallas(in_size=(C, H, W), dt=dt, output=False)
    currents = 50.0 * jax.random.normal(key1, (T, B, C, H, W), dtype=jnp.float32)

    spikes = jax.block_until_ready(lif.forward_sequence(currents))
    v_state = jax.block_until_ready(lif.v)

    v_ref = jnp.zeros((B, C * H * W), dtype=jnp.float32)
    for t in range(T):
        cur2d = currents[t].reshape(B, -1)
        s_ref, _, v_ref = _reference_step(cur2d, v_ref, lif.w, dt, lif.min_tau,
                                          lif.threshold, lif.vrest, lif.r)
        ok &= bool(jnp.allclose(spikes[t].reshape(B, -1).astype(jnp.float32), s_ref, atol=1e-5))
    ok &= bool(jnp.allclose(v_state, v_ref, atol=1e-5))

    # --- test 2: non-128-multiple feature size + output=True (v_tmp + padding paths)
    T2, B2, F2 = 5, 3, 100
    lif2 = LIFPallas(in_size=(F2,), dt=dt, output=True)
    cur2 = 40.0 * jax.random.normal(key2, (T2, B2, F2), dtype=jnp.float32)
    spikes2, vtmp2 = lif2.forward_sequence(cur2)
    spikes2 = jax.block_until_ready(spikes2)
    vtmp2 = jax.block_until_ready(vtmp2)

    v_ref2 = jnp.zeros((B2, F2), dtype=jnp.float32)
    for t in range(T2):
        s_ref, vt_ref, v_ref2 = _reference_step(cur2[t], v_ref2, lif2.w, dt, lif2.min_tau,
                                                lif2.threshold, lif2.vrest, lif2.r)
        ok &= bool(jnp.allclose(spikes2[t].astype(jnp.float32), s_ref, atol=1e-5))
        ok &= bool(jnp.allclose(vtmp2[t], vt_ref, atol=1e-5))
    ok &= bool(jnp.allclose(lif2.v, v_ref2, atol=1e-5))

    print("KERNEL_OK" if ok else "MISMATCH")
</pallas_src>

<mosaic_0001>
module attributes {stable_mosaic.version = 11 : i64} {
  func.func @kernel(%arg0: i32, %arg1: i32, %arg2: memref<8x8x256xf32, #tpu.memory_space<vmem>>, %arg3: memref<8x256xf32, #tpu.memory_space<vmem>>, %arg4: memref<8x256xf32, #tpu.memory_space<vmem>>, %arg5: memref<8x8x256xbf16, #tpu.memory_space<vmem>>, %arg6: memref<8x256xf32, #tpu.memory_space<vmem>>) attributes {dimension_semantics = [#tpu.dimension_semantics<parallel>, #tpu.dimension_semantics<arbitrary>], iteration_bounds = array<i64: 1, 1>, scalar_prefetch = 0 : i64, scratch_operands = 0 : i64, tpu.core_type = #tpu.core_type<tc>, window_params = [{transform_indices = @transform_0, window_bounds = array<i64: 8, 8, 256>}, {transform_indices = @transform_1, window_bounds = array<i64: 8, 256>}, {transform_indices = @transform_2, window_bounds = array<i64: 8, 256>}, {transform_indices = @transform_3, window_bounds = array<i64: 8, 8, 256>}, {transform_indices = @transform_4, window_bounds = array<i64: 8, 256>}]} {
    %c0_i32 = arith.constant 0 : i32
    %0 = arith.cmpi eq, %arg1, %c0_i32 : i32
    %1 = arith.extui %0 : i1 to i32
    %c0_i32_0 = arith.constant 0 : i32
    %2 = arith.cmpi ne, %1, %c0_i32_0 : i32
    scf.if %2 {
      %c0_62 = arith.constant 0 : index
      %c0_63 = arith.constant 0 : index
      %158 = vector.load %arg4[%c0_62, %c0_63] : memref<8x256xf32, #tpu.memory_space<vmem>>, vector<8x256xf32>
      %c0_64 = arith.constant 0 : index
      %c0_65 = arith.constant 0 : index
      %159 = vector.load %arg6[%c0_64, %c0_65] : memref<8x256xf32, #tpu.memory_space<vmem>>, vector<8x256xf32>
      tpu.vector_store %arg6[%c0_64, %c0_65], %158 {strides = array<i32>} : memref<8x256xf32, #tpu.memory_space<vmem>>, vector<8x256xf32>,
    } else {
    }
    %c0 = arith.constant 0 : index
    %c0_1 = arith.constant 0 : index
    %3 = vector.load %arg3[%c0, %c0_1] : memref<8x256xf32, #tpu.memory_space<vmem>>, vector<8x256xf32>
    %c0_2 = arith.constant 0 : index
    %c0_3 = arith.constant 0 : index
    %4 = vector.load %arg6[%c0_2, %c0_3] : memref<8x256xf32, #tpu.memory_space<vmem>>, vector<8x256xf32>
    %c0_i32_4 = arith.constant 0 : i32
    %5 = arith.index_cast %c0_i32_4 : i32 to index
    %c0_5 = arith.constant 0 : index
    %c0_6 = arith.constant 0 : index
    %6 = vector.load %arg2[%5, %c0_5, %c0_6] : memref<8x8x256xf32, #tpu.memory_space<vmem>>, vector<1x8x256xf32>
    %7 = vector.shape_cast %6 : vector<1x8x256xf32> to vector<8x256xf32>
    %cst = arith.constant 0.000000e+00 : f32
    %8 = vector.broadcast %cst : f32 to vector<8x256xf32>
    %9 = arith.subf %8, %4 : vector<8x256xf32>
    %10 = arith.addf %9, %7 : vector<8x256xf32>
    %11 = arith.mulf %3, %10 : vector<8x256xf32>
    %12 = arith.addf %4, %11 : vector<8x256xf32>
    %cst_7 = arith.constant 1.000000e+00 : f32
    %13 = vector.broadcast %cst_7 : f32 to vector<8x256xf32>
    %14 = arith.cmpf ogt, %12, %13 : vector<8x256xf32>
    %15 = arith.extui %14 : vector<8x256xi1> to vector<8x256xi32>
    %16 = arith.sitofp %15 : vector<8x256xi32> to vector<8x256xf32>
    %17 = arith.truncf %16 : vector<8x256xf32> to vector<8x256xbf16>
    %18 = arith.index_cast %c0_i32_4 : i32 to index
    %c0_8 = arith.constant 0 : index
    %c0_9 = arith.constant 0 : index
    %19 = vector.load %arg5[%18, %c0_8, %c0_9] : memref<8x8x256xbf16, #tpu.memory_space<vmem>>, vector<1x8x256xbf16>
    %20 = vector.shape_cast %19 : vector<1x8x256xbf16> to vector<8x256xbf16>
    %21 = vector.shape_cast %17 : vector<8x256xbf16> to vector<1x8x256xbf16>
    tpu.vector_store %arg5[%18, %c0_8, %c0_9], %21 {strides = array<i32>} : memref<8x8x256xbf16, #tpu.memory_space<vmem>>, vector<1x8x256xbf16>,
    %cst_10 = arith.constant 0.000000e+00 : f32
    %22 = vector.broadcast %cst_10 : f32 to vector<8x256xf32>
    %23 = arith.select %14, %22, %12 : vector<8x256xi1>, vector<8x256xf32>
    %c1_i32 = arith.constant 1 : i32
    %24 = arith.index_cast %c1_i32 : i32 to index
    %c0_11 = arith.constant 0 : index
    %c0_12 = arith.constant 0 : index
    %25 = vector.load %arg2[%24, %c0_11, %c0_12] : memref<8x8x256xf32, #tpu.memory_space<vmem>>, vector<1x8x256xf32>
    %26 = vector.shape_cast %25 : vector<1x8x256xf32> to vector<8x256xf32>
    %cst_13 = arith.constant 0.000000e+00 : f32
    %27 = vector.broadcast %cst_13 : f32 to vector<8x256xf32>
    %28 = arith.subf %27, %23 : vector<8x256xf32>
    %29 = arith.addf %28, %26 : vector<8x256xf32>
    %30 = arith.mulf %3, %29 : vector<8x256xf32>
    %31 = arith.addf %23, %30 : vector<8x256xf32>
    %cst_14 = arith.constant 1.000000e+00 : f32
    %32 = vector.broadcast %cst_14 : f32 to vector<8x256xf32>
    %33 = arith.cmpf ogt, %31, %32 : vector<8x256xf32>
    %34 = arith.extui %33 : vector<8x256xi1> to vector<8x256xi32>
    %35 = arith.sitofp %34 : vector<8x256xi32> to vector<8x256xf32>
    %36 = arith.truncf %35 : vector<8x256xf32> to vector<8x256xbf16>
    %37 = arith.index_cast %c1_i32 : i32 to index
    %c0_15 = arith.constant 0 : index
    %c0_16 = arith.constant 0 : index
    %38 = vector.load %arg5[%37, %c0_15, %c0_16] : memref<8x8x256xbf16, #tpu.memory_space<vmem>>, vector<1x8x256xbf16>
    %39 = vector.shape_cast %38 : vector<1x8x256xbf16> to vector<8x256xbf16>
    %40 = vector.shape_cast %36 : vector<8x256xbf16> to vector<1x8x256xbf16>
    tpu.vector_store %arg5[%37, %c0_15, %c0_16], %40 {strides = array<i32>} : memref<8x8x256xbf16, #tpu.memory_space<vmem>>, vector<1x8x256xbf16>,
    %cst_17 = arith.constant 0.000000e+00 : f32
    %41 = vector.broadcast %cst_17 : f32 to vector<8x256xf32>
    %42 = arith.select %33, %41, %31 : vector<8x256xi1>, vector<8x256xf32>
    %c2_i32 = arith.constant 2 : i32
    %43 = arith.index_cast %c2_i32 : i32 to index
    %c0_18 = arith.constant 0 : index
    %c0_19 = arith.constant 0 : index
    %44 = vector.load %arg2[%43, %c0_18, %c0_19] : memref<8x8x256xf32, #tpu.memory_space<vmem>>, vector<1x8x256xf32>
    %45 = vector.shape_cast %44 : vector<1x8x256xf32> to vector<8x256xf32>
    %cst_20 = arith.constant 0.000000e+00 : f32
    %46 = vector.broadcast %cst_20 : f32 to vector<8x256xf32>
    %47 = arith.subf %46, %42 : vector<8x256xf32>
    %48 = arith.addf %47, %45 : vector<8x256xf32>
    %49 = arith.mulf %3, %48 : vector<8x256xf32>
    %50 = arith.addf %42, %49 : vector<8x256xf32>
    %cst_21 = arith.constant 1.000000e+00 : f32
    %51 = vector.broadcast %cst_21 : f32 to vector<8x256xf32>
    %52 = arith.cmpf ogt, %50, %51 : vector<8x256xf32>
    %53 = arith.extui %52 : vector<8x256xi1> to vector<8x256xi32>
    %54 = arith.sitofp %53 : vector<8x256xi32> to vector<8x256xf32>
    %55 = arith.truncf %54 : vector<8x256xf32> to vector<8x256xbf16>
    %56 = arith.index_cast %c2_i32 : i32 to index
    %c0_22 = arith.constant 0 : index
    %c0_23 = arith.constant 0 : index
    %57 = vector.load %arg5[%56, %c0_22, %c0_23] : memref<8x8x256xbf16, #tpu.memory_space<vmem>>, vector<1x8x256xbf16>
    %58 = vector.shape_cast %57 : vector<1x8x256xbf16> to vector<8x256xbf16>
    %59 = vector.shape_cast %55 : vector<8x256xbf16> to vector<1x8x256xbf16>
    tpu.vector_store %arg5[%56, %c0_22, %c0_23], %59 {strides = array<i32>} : memref<8x8x256xbf16, #tpu.memory_space<vmem>>, vector<1x8x256xbf16>,
    %cst_24 = arith.constant 0.000000e+00 : f32
    %60 = vector.broadcast %cst_24 : f32 to vector<8x256xf32>
    %61 = arith.select %52, %60, %50 : vector<8x256xi1>, vector<8x256xf32>
    %c3_i32 = arith.constant 3 : i32
    %62 = arith.index_cast %c3_i32 : i32 to index
    %c0_25 = arith.constant 0 : index
    %c0_26 = arith.constant 0 : index
    %63 = vector.load %arg2[%62, %c0_25, %c0_26] : memref<8x8x256xf32, #tpu.memory_space<vmem>>, vector<1x8x256xf32>
    %64 = vector.shape_cast %63 : vector<1x8x256xf32> to vector<8x256xf32>
    %cst_27 = arith.constant 0.000000e+00 : f32
    %65 = vector.broadcast %cst_27 : f32 to vector<8x256xf32>
    %66 = arith.subf %65, %61 : vector<8x256xf32>
    %67 = arith.addf %66, %64 : vector<8x256xf32>
    %68 = arith.mulf %3, %67 : vector<8x256xf32>
    %69 = arith.addf %61, %68 : vector<8x256xf32>
    %cst_28 = arith.constant 1.000000e+00 : f32
    %70 = vector.broadcast %cst_28 : f32 to vector<8x256xf32>
    %71 = arith.cmpf ogt, %69, %70 : vector<8x256xf32>
    %72 = arith.extui %71 : vector<8x256xi1> to vector<8x256xi32>
    %73 = arith.sitofp %72 : vector<8x256xi32> to vector<8x256xf32>
    %74 = arith.truncf %73 : vector<8x256xf32> to vector<8x256xbf16>
    %75 = arith.index_cast %c3_i32 : i32 to index
    %c0_29 = arith.constant 0 : index
    %c0_30 = arith.constant 0 : index
    %76 = vector.load %arg5[%75, %c0_29, %c0_30] : memref<8x8x256xbf16, #tpu.memory_space<vmem>>, vector<1x8x256xbf16>
    %77 = vector.shape_cast %76 : vector<1x8x256xbf16> to vector<8x256xbf16>
    %78 = vector.shape_cast %74 : vector<8x256xbf16> to vector<1x8x256xbf16>
    tpu.vector_store %arg5[%75, %c0_29, %c0_30], %78 {strides = array<i32>} : memref<8x8x256xbf16, #tpu.memory_space<vmem>>, vector<1x8x256xbf16>,
    %cst_31 = arith.constant 0.000000e+00 : f32
    %79 = vector.broadcast %cst_31 : f32 to vector<8x256xf32>
    %80 = arith.select %71, %79, %69 : vector<8x256xi1>, vector<8x256xf32>
    %c4_i32 = arith.constant 4 : i32
    %81 = arith.index_cast %c4_i32 : i32 to index
    %c0_32 = arith.constant 0 : index
    %c0_33 = arith.constant 0 : index
    %82 = vector.load %arg2[%81, %c0_32, %c0_33] : memref<8x8x256xf32, #tpu.memory_space<vmem>>, vector<1x8x256xf32>
    %83 = vector.shape_cast %82 : vector<1x8x256xf32> to vector<8x256xf32>
    %cst_34 = arith.constant 0.000000e+00 : f32
    %84 = vector.broadcast %cst_34 : f32 to vector<8x256xf32>
    %85 = arith.subf %84, %80 : vector<8x256xf32>
    %86 = arith.addf %85, %83 : vector<8x256xf32>
    %87 = arith.mulf %3, %86 : vector<8x256xf32>
    %88 = arith.addf %80, %87 : vector<8x256xf32>
    %cst_35 = arith.constant 1.000000e+00 : f32
    %89 = vector.broadcast %cst_35 : f32 to vector<8x256xf32>
    %90 = arith.cmpf ogt, %88, %89 : vector<8x256xf32>
    %91 = arith.extui %90 : vector<8x256xi1> to vector<8x256xi32>
    %92 = arith.sitofp %91 : vector<8x256xi32> to vector<8x256xf32>
    %93 = arith.truncf %92 : vector<8x256xf32> to vector<8x256xbf16>
    %94 = arith.index_cast %c4_i32 : i32 to index
    %c0_36 = arith.constant 0 : index
    %c0_37 = arith.constant 0 : index
    %95 = vector.load %arg5[%94, %c0_36, %c0_37] : memref<8x8x256xbf16, #tpu.memory_space<vmem>>, vector<1x8x256xbf16>
    %96 = vector.shape_cast %95 : vector<1x8x256xbf16> to vector<8x256xbf16>
    %97 = vector.shape_cast %93 : vector<8x256xbf16> to vector<1x8x256xbf16>
    tpu.vector_store %arg5[%94, %c0_36, %c0_37], %97 {strides = array<i32>} : memref<8x8x256xbf16, #tpu.memory_space<vmem>>, vector<1x8x256xbf16>,
    %cst_38 = arith.constant 0.000000e+00 : f32
    %98 = vector.broadcast %cst_38 : f32 to vector<8x256xf32>
    %99 = arith.select %90, %98, %88 : vector<8x256xi1>, vector<8x256xf32>
    %c5_i32 = arith.constant 5 : i32
    %100 = arith.index_cast %c5_i32 : i32 to index
    %c0_39 = arith.constant 0 : index
    %c0_40 = arith.constant 0 : index
    %101 = vector.load %arg2[%100, %c0_39, %c0_40] : memref<8x8x256xf32, #tpu.memory_space<vmem>>, vector<1x8x256xf32>
    %102 = vector.shape_cast %101 : vector<1x8x256xf32> to vector<8x256xf32>
    %cst_41 = arith.constant 0.000000e+00 : f32
    %103 = vector.broadcast %cst_41 : f32 to vector<8x256xf32>
    %104 = arith.subf %103, %99 : vector<8x256xf32>
    %105 = arith.addf %104, %102 : vector<8x256xf32>
    %106 = arith.mulf %3, %105 : vector<8x256xf32>
    %107 = arith.addf %99, %106 : vector<8x256xf32>
    %cst_42 = arith.constant 1.000000e+00 : f32
    %108 = vector.broadcast %cst_42 : f32 to vector<8x256xf32>
    %109 = arith.cmpf ogt, %107, %108 : vector<8x256xf32>
    %110 = arith.extui %109 : vector<8x256xi1> to vector<8x256xi32>
    %111 = arith.sitofp %110 : vector<8x256xi32> to vector<8x256xf32>
    %112 = arith.truncf %111 : vector<8x256xf32> to vector<8x256xbf16>
    %113 = arith.index_cast %c5_i32 : i32 to index
    %c0_43 = arith.constant 0 : index
    %c0_44 = arith.constant 0 : index
    %114 = vector.load %arg5[%113, %c0_43, %c0_44] : memref<8x8x256xbf16, #tpu.memory_space<vmem>>, vector<1x8x256xbf16>
    %115 = vector.shape_cast %114 : vector<1x8x256xbf16> to vector<8x256xbf16>
    %116 = vector.shape_cast %112 : vector<8x256xbf16> to vector<1x8x256xbf16>
    tpu.vector_store %arg5[%113, %c0_43, %c0_44], %116 {strides = array<i32>} : memref<8x8x256xbf16, #tpu.memory_space<vmem>>, vector<1x8x256xbf16>,
    %cst_45 = arith.constant 0.000000e+00 : f32
    %117 = vector.broadcast %cst_45 : f32 to vector<8x256xf32>
    %118 = arith.select %109, %117, %107 : vector<8x256xi1>, vector<8x256xf32>
    %c6_i32 = arith.constant 6 : i32
    %119 = arith.index_cast %c6_i32 : i32 to index
    %c0_46 = arith.constant 0 : index
    %c0_47 = arith.constant 0 : index
    %120 = vector.load %arg2[%119, %c0_46, %c0_47] : memref<8x8x256xf32, #tpu.memory_space<vmem>>, vector<1x8x256xf32>
    %121 = vector.shape_cast %120 : vector<1x8x256xf32> to vector<8x256xf32>
    %cst_48 = arith.constant 0.000000e+00 : f32
    %122 = vector.broadcast %cst_48 : f32 to vector<8x256xf32>
    %123 = arith.subf %122, %118 : vector<8x256xf32>
    %124 = arith.addf %123, %121 : vector<8x256xf32>
    %125 = arith.mulf %3, %124 : vector<8x256xf32>
    %126 = arith.addf %118, %125 : vector<8x256xf32>
    %cst_49 = arith.constant 1.000000e+00 : f32
    %127 = vector.broadcast %cst_49 : f32 to vector<8x256xf32>
    %128 = arith.cmpf ogt, %126, %127 : vector<8x256xf32>
    %129 = arith.extui %128 : vector<8x256xi1> to vector<8x256xi32>
    %130 = arith.sitofp %129 : vector<8x256xi32> to vector<8x256xf32>
    %131 = arith.truncf %130 : vector<8x256xf32> to vector<8x256xbf16>
    %132 = arith.index_cast %c6_i32 : i32 to index
    %c0_50 = arith.constant 0 : index
    %c0_51 = arith.constant 0 : index
    %133 = vector.load %arg5[%132, %c0_50, %c0_51] : memref<8x8x256xbf16, #tpu.memory_space<vmem>>, vector<1x8x256xbf16>
    %134 = vector.shape_cast %133 : vector<1x8x256xbf16> to vector<8x256xbf16>
    %135 = vector.shape_cast %131 : vector<8x256xbf16> to vector<1x8x256xbf16>
    tpu.vector_store %arg5[%132, %c0_50, %c0_51], %135 {strides = array<i32>} : memref<8x8x256xbf16, #tpu.memory_space<vmem>>, vector<1x8x256xbf16>,
    %cst_52 = arith.constant 0.000000e+00 : f32
    %136 = vector.broadcast %cst_52 : f32 to vector<8x256xf32>
    %137 = arith.select %128, %136, %126 : vector<8x256xi1>, vector<8x256xf32>
    %c7_i32 = arith.constant 7 : i32
    %138 = arith.index_cast %c7_i32 : i32 to index
    %c0_53 = arith.constant 0 : index
    %c0_54 = arith.constant 0 : index
    %139 = vector.load %arg2[%138, %c0_53, %c0_54] : memref<8x8x256xf32, #tpu.memory_space<vmem>>, vector<1x8x256xf32>
    %140 = vector.shape_cast %139 : vector<1x8x256xf32> to vector<8x256xf32>
    %cst_55 = arith.constant 0.000000e+00 : f32
    %141 = vector.broadcast %cst_55 : f32 to vector<8x256xf32>
    %142 = arith.subf %141, %137 : vector<8x256xf32>
    %143 = arith.addf %142, %140 : vector<8x256xf32>
    %144 = arith.mulf %3, %143 : vector<8x256xf32>
    %145 = arith.addf %137, %144 : vector<8x256xf32>
    %cst_56 = arith.constant 1.000000e+00 : f32
    %146 = vector.broadcast %cst_56 : f32 to vector<8x256xf32>
    %147 = arith.cmpf ogt, %145, %146 : vector<8x256xf32>
    %148 = arith.extui %147 : vector<8x256xi1> to vector<8x256xi32>
    %149 = arith.sitofp %148 : vector<8x256xi32> to vector<8x256xf32>
    %150 = arith.truncf %149 : vector<8x256xf32> to vector<8x256xbf16>
    %151 = arith.index_cast %c7_i32 : i32 to index
    %c0_57 = arith.constant 0 : index
    %c0_58 = arith.constant 0 : index
    %152 = vector.load %arg5[%151, %c0_57, %c0_58] : memref<8x8x256xbf16, #tpu.memory_space<vmem>>, vector<1x8x256xbf16>
    %153 = vector.shape_cast %152 : vector<1x8x256xbf16> to vector<8x256xbf16>
    %154 = vector.shape_cast %150 : vector<8x256xbf16> to vector<1x8x256xbf16>
    tpu.vector_store %arg5[%151, %c0_57, %c0_58], %154 {strides = array<i32>} : memref<8x8x256xbf16, #tpu.memory_space<vmem>>, vector<1x8x256xbf16>,
    %cst_59 = arith.constant 0.000000e+00 : f32
    %155 = vector.broadcast %cst_59 : f32 to vector<8x256xf32>
    %156 = arith.select %147, %155, %145 : vector<8x256xi1>, vector<8x256xf32>
    %c8_i32 = arith.constant 8 : i32
    %c0_60 = arith.constant 0 : index
    %c0_61 = arith.constant 0 : index
    %157 = vector.load %arg6[%c0_60, %c0_61] : memref<8x256xf32, #tpu.memory_space<vmem>>, vector<8x256xf32>
    tpu.vector_store %arg6[%c0_60, %c0_61], %156 {strides = array<i32>} : memref<8x256xf32, #tpu.memory_space<vmem>>, vector<8x256xf32>,
    return
  }
  func.func @transform_0(%arg0: i32, %arg1: i32) -> (i32, i32, i32) {
    %c0_i32 = arith.constant 0 : i32
    %c0_i32_0 = arith.constant 0 : i32
    return %arg1, %arg0, %c0_i32 : i32, i32, i32
  }
  func.func @transform_1(%arg0: i32, %arg1: i32) -> (i32, i32) {
    %c0_i32 = arith.constant 0 : i32
    %c0_i32_0 = arith.constant 0 : i32
    return %arg0, %c0_i32 : i32, i32
  }
  func.func @transform_2(%arg0: i32, %arg1: i32) -> (i32, i32) {
    %c0_i32 = arith.constant 0 : i32
    %c0_i32_0 = arith.constant 0 : i32
    return %arg0, %c0_i32 : i32, i32
  }
  func.func @transform_3(%arg0: i32, %arg1: i32) -> (i32, i32, i32) {
    %c0_i32 = arith.constant 0 : i32
    %c0_i32_0 = arith.constant 0 : i32
    return %arg1, %arg0, %c0_i32 : i32, i32, i32
  }
  func.func @transform_4(%arg0: i32, %arg1: i32) -> (i32, i32) {
    %c0_i32 = arith.constant 0 : i32
    %c0_i32_0 = arith.constant 0 : i32
    return %arg0, %c0_i32 : i32, i32
  }
}

</mosaic_0001>

<bundles_post_ra>
// kernel: fn.1
= control target key start
LH: loop header
LB: loop body
LE: loop exit
PB: predicated region body
PF: predicated region fallthrough
CT: control target
= control target key end

     0   :  { %v250_v14 = vmov 0.0   ;;  %s402_s2 = inlined_call_operand.vmem [shape: f32[8,256], index: 2, kind: input, shape index: {}, may-alias: {2,4}]   ;;  %s403_s0 = inlined_call_operand.vmem [shape: f32[8,8,256], index: 0, kind: input, shape index: {}]   ;;  %s404_s1 = inlined_call_operand.vmem [shape: f32[8,256], index: 1, kind: input, shape index: {}]   ;;  %s405_s3 = inlined_call_operand.vmem [shape: bf16[8,8,256], index: 3, kind: output, shape index: {0}]   ;;  %s406_s4 = inlined_call_operand.vmem [shape: f32[8,256], index: 4, kind: output, shape index: {1}, may-alias: {2,4}]  }
   0x1   :  { %v20_v0 = vld [vmem:[%s402_s2] sm:$0xff]  ;;  %v21_v1 = vld [vmem:[%s402_s2 + $0x8] sm:$0xff]  ;;  %v214_v19 = vld [vmem:[%s403_s0 + $0x10] sm:$0xff] }
   0x2   :  { %v28_v2 = vld [vmem:[%s403_s0] sm:$0xff]  ;;  %v29_v3 = vld [vmem:[%s403_s0 + $0x8] sm:$0xff]  ;;  %v30_v4 = vsub.f32 0.0, %v20_v0  ;;  %v31_v5 = vsub.f32 0.0, %v21_v1  ;;  %v215_v20 = vld [vmem:[%s403_s0 + $0x18] sm:$0xff] }
   0x3   :  { %v291_v6 = vld [vmem:[%s404_s1] sm:$0xff]  ;;  %v296_v7 = vld [vmem:[%s404_s1 + $0x8] sm:$0xff]  ;;  %v224_v49 = vld [vmem:[%s403_s0 + $0x30] sm:$0xff] }
   0x4   :  { %v32_v8 = vadd.f32 %v30_v4, %v28_v2  ;;  %v33_v9 = vadd.f32 %v31_v5, %v29_v3  ;;  %v219_v34 = vld [vmem:[%s403_s0 + $0x20] sm:$0xff]  ;;  %v220_v35 = vld [vmem:[%s403_s0 + $0x28] sm:$0xff]  ;;  %v225_v50 = vld [vmem:[%s403_s0 + $0x38] sm:$0xff] }
   0x6   :  { %v34_v10 = vmul.f32 %v32_v8, %v291_v6  ;;  %v35_v11 = vmul.f32 %v33_v9, %v296_v7 }
   0x8   :  { %v36_v12 = vadd.f32 %v34_v10, %v20_v0  ;;  %v37_v13 = vadd.f32 %v35_v11, %v21_v1  ;;  %v229_v0 = vld [vmem:[%s403_s0 + $0x40] sm:$0xff]  ;;  %v230_v1 = vld [vmem:[%s403_s0 + $0x48] sm:$0xff] }
   0xa   :  { %vm38_vm0 = vcmp.gt.f32.partialorder %v36_v12, 1.0  ;;  %vm39_vm1 = vcmp.gt.f32.partialorder %v37_v13, 1.0 }
   0xb   :  { %v212_v15 = vsel %vm38_vm0, 1.0, %v250_v14  ;;  %v213_v16 = vsel %vm39_vm1, 1.0, %v250_v14  ;;  %v46_v17 = vsel %vm38_vm0, 0.0, %v36_v12  ;;  %v47_v18 = vsel %vm39_vm1, 0.0, %v37_v13 }
   0xc   :  { %v44_v21 = vpack.c.bf16 %v213_v16, %v212_v15  ;;  %v51_v22 = vsub.f32 0.0, %v46_v17  ;;  %v52_v23 = vsub.f32 0.0, %v47_v18 }
   0xe   :  { %45 = vst [vmem:[%s405_s3] sm:$0xff] %v44_v21  ;;  %v53_v24 = vadd.f32 %v214_v19, %v51_v22  ;;  %v54_v25 = vadd.f32 %v215_v20, %v52_v23  ;;  %v235_v19 = vld [vmem:[%s403_s0 + $0x58] sm:$0xff] }
  0x10   :  { %v55_v26 = vmul.f32 %v53_v24, %v291_v6  ;;  %v56_v27 = vmul.f32 %v54_v25, %v296_v7 }
  0x12   :  { %v57_v28 = vadd.f32 %v55_v26, %v46_v17  ;;  %v58_v29 = vadd.f32 %v56_v27, %v47_v18  ;;  %v234_v18 = vld [vmem:[%s403_s0 + $0x50] sm:$0xff] }
  0x14   :  { %vm59_vm2 = vcmp.gt.f32.partialorder %v57_v28, 1.0  ;;  %vm60_vm3 = vcmp.gt.f32.partialorder %v58_v29, 1.0 }
  0x15   :  { %v216_v30 = vsel %vm59_vm2, 1.0, %v250_v14  ;;  %v217_v31 = vsel %vm60_vm3, 1.0, %v250_v14  ;;  %v68_v32 = vsel %vm59_vm2, 0.0, %v57_v28  ;;  %v69_v33 = vsel %vm60_vm3, 0.0, %v58_v29 }
  0x16   :  { %v65_v36 = vpack.c.bf16 %v217_v31, %v216_v30  ;;  %v73_v37 = vsub.f32 0.0, %v68_v32  ;;  %v74_v38 = vsub.f32 0.0, %v69_v33 }
  0x18   :  { %218 = vst [vmem:[%s405_s3 + $0x8] sm:$0xff] %v65_v36  ;;  %v75_v39 = vadd.f32 %v219_v34, %v73_v37  ;;  %v76_v40 = vadd.f32 %v220_v35, %v74_v38  ;;  %v240_v34 = vld [vmem:[%s403_s0 + $0x68] sm:$0xff] }
  0x1a   :  { %v77_v41 = vmul.f32 %v75_v39, %v291_v6  ;;  %v78_v42 = vmul.f32 %v76_v40, %v296_v7 }
  0x1c   :  { %v79_v43 = vadd.f32 %v77_v41, %v68_v32  ;;  %v80_v44 = vadd.f32 %v78_v42, %v69_v33  ;;  %v239_v33 = vld [vmem:[%s403_s0 + $0x60] sm:$0xff] }
  0x1e   :  { %vm81_vm4 = vcmp.gt.f32.partialorder %v79_v43, 1.0  ;;  %vm82_vm5 = vcmp.gt.f32.partialorder %v80_v44, 1.0 }
  0x1f   :  { %v221_v45 = vsel %vm81_vm4, 1.0, %v250_v14  ;;  %v222_v46 = vsel %vm82_vm5, 1.0, %v250_v14  ;;  %v90_v47 = vsel %vm81_vm4, 0.0, %v79_v43  ;;  %v91_v48 = vsel %vm82_vm5, 0.0, %v80_v44 }
  0x20   :  { %v87_v51 = vpack.c.bf16 %v222_v46, %v221_v45  ;;  %v95_v52 = vsub.f32 0.0, %v90_v47  ;;  %v96_v53 = vsub.f32 0.0, %v91_v48 }
  0x22   :  { %223 = vst [vmem:[%s405_s3 + $0x10] sm:$0xff] %v87_v51  ;;  %v97_v54 = vadd.f32 %v224_v49, %v95_v52  ;;  %v98_v55 = vadd.f32 %v225_v50, %v96_v53  ;;  %v245_v49 = vld [vmem:[%s403_s0 + $0x78] sm:$0xff] }
  0x24   :  { %v99_v56 = vmul.f32 %v97_v54, %v291_v6  ;;  %v100_v57 = vmul.f32 %v98_v55, %v296_v7 }
  0x26   :  { %v101_v58 = vadd.f32 %v99_v56, %v90_v47  ;;  %v102_v59 = vadd.f32 %v100_v57, %v91_v48  ;;  %v244_v48 = vld [vmem:[%s403_s0 + $0x70] sm:$0xff] }
  0x28   :  { %vm103_vm6 = vcmp.gt.f32.partialorder %v101_v58, 1.0  ;;  %vm104_vm7 = vcmp.gt.f32.partialorder %v102_v59, 1.0 }
  0x29   :  { %v226_v60 = vsel %vm103_vm6, 1.0, %v250_v14  ;;  %v227_v61 = vsel %vm104_vm7, 1.0, %v250_v14  ;;  %v112_v62 = vsel %vm103_vm6, 0.0, %v101_v58  ;;  %v113_v63 = vsel %vm104_vm7, 0.0, %v102_v59 }
  0x2a   :  { %v109_v2 = vpack.c.bf16 %v227_v61, %v226_v60  ;;  %v117_v3 = vsub.f32 0.0, %v112_v62  ;;  %v118_v4 = vsub.f32 0.0, %v113_v63 }
  0x2c   :  { %228 = vst [vmem:[%s405_s3 + $0x18] sm:$0xff] %v109_v2  ;;  %v119_v5 = vadd.f32 %v229_v0, %v117_v3  ;;  %v120_v8 = vadd.f32 %v230_v1, %v118_v4 }
  0x2e   :  { %v121_v9 = vmul.f32 %v119_v5, %v291_v6  ;;  %v122_v10 = vmul.f32 %v120_v8, %v296_v7 }
  0x30   :  { %v123_v11 = vadd.f32 %v121_v9, %v112_v62  ;;  %v124_v12 = vadd.f32 %v122_v10, %v113_v63 }
  0x32   :  { %vm125_vm8 = vcmp.gt.f32.partialorder %v123_v11, 1.0  ;;  %vm126_vm9 = vcmp.gt.f32.partialorder %v124_v12, 1.0 }
  0x33   :  { %v231_v13 = vsel %vm125_vm8, 1.0, %v250_v14  ;;  %v232_v15 = vsel %vm126_vm9, 1.0, %v250_v14  ;;  %v134_v16 = vsel %vm125_vm8, 0.0, %v123_v11  ;;  %v135_v17 = vsel %vm126_vm9, 0.0, %v124_v12 }
  0x34   :  { %v131_v20 = vpack.c.bf16 %v232_v15, %v231_v13  ;;  %v139_v21 = vsub.f32 0.0, %v134_v16  ;;  %v140_v22 = vsub.f32 0.0, %v135_v17 }
  0x36   :  { %233 = vst [vmem:[%s405_s3 + $0x20] sm:$0xff] %v131_v20  ;;  %v141_v23 = vadd.f32 %v234_v18, %v139_v21  ;;  %v142_v24 = vadd.f32 %v235_v19, %v140_v22 }
  0x38   :  { %v143_v25 = vmul.f32 %v141_v23, %v291_v6  ;;  %v144_v26 = vmul.f32 %v142_v24, %v296_v7 }
  0x3a   :  { %v145_v27 = vadd.f32 %v143_v25, %v134_v16  ;;  %v146_v28 = vadd.f32 %v144_v26, %v135_v17 }
  0x3c   :  { %vm147_vm10 = vcmp.gt.f32.partialorder %v145_v27, 1.0  ;;  %vm148_vm11 = vcmp.gt.f32.partialorder %v146_v28, 1.0 }
  0x3d   :  { %v236_v29 = vsel %vm147_vm10, 1.0, %v250_v14  ;;  %v237_v30 = vsel %vm148_vm11, 1.0, %v250_v14  ;;  %v156_v31 = vsel %vm147_vm10, 0.0, %v145_v27  ;;  %v157_v32 = vsel %vm148_vm11, 0.0, %v146_v28 }
  0x3e   :  { %v153_v35 = vpack.c.bf16 %v237_v30, %v236_v29  ;;  %v161_v36 = vsub.f32 0.0, %v156_v31  ;;  %v162_v37 = vsub.f32 0.0, %v157_v32 }
  0x40   :  { %238 = vst [vmem:[%s405_s3 + $0x28] sm:$0xff] %v153_v35  ;;  %v163_v38 = vadd.f32 %v239_v33, %v161_v36  ;;  %v164_v39 = vadd.f32 %v240_v34, %v162_v37 }
  0x42   :  { %v165_v40 = vmul.f32 %v163_v38, %v291_v6  ;;  %v166_v41 = vmul.f32 %v164_v39, %v296_v7 }
  0x44   :  { %v167_v42 = vadd.f32 %v165_v40, %v156_v31  ;;  %v168_v43 = vadd.f32 %v166_v41, %v157_v32 }
  0x46   :  { %vm169_vm12 = vcmp.gt.f32.partialorder %v167_v42, 1.0  ;;  %vm170_vm13 = vcmp.gt.f32.partialorder %v168_v43, 1.0 }
  0x47   :  { %v241_v44 = vsel %vm169_vm12, 1.0, %v250_v14  ;;  %v242_v45 = vsel %vm170_vm13, 1.0, %v250_v14  ;;  %v178_v46 = vsel %vm169_vm12, 0.0, %v167_v42  ;;  %v179_v47 = vsel %vm170_vm13, 0.0, %v168_v43 }
  0x48   :  { %v175_v50 = vpack.c.bf16 %v242_v45, %v241_v44  ;;  %v183_v51 = vsub.f32 0.0, %v178_v46  ;;  %v184_v52 = vsub.f32 0.0, %v179_v47 }
  0x4a   :  { %243 = vst [vmem:[%s405_s3 + $0x30] sm:$0xff] %v175_v50  ;;  %v185_v53 = vadd.f32 %v244_v48, %v183_v51  ;;  %v186_v54 = vadd.f32 %v245_v49, %v184_v52 }
  0x4c   :  { %v187_v55 = vmul.f32 %v185_v53, %v291_v6  ;;  %v188_v56 = vmul.f32 %v186_v54, %v296_v7 }
  0x4e   :  { %v189_v57 = vadd.f32 %v187_v55, %v178_v46  ;;  %v190_v58 = vadd.f32 %v188_v56, %v179_v47 }
  0x50   :  { %vm191_vm14 = vcmp.gt.f32.partialorder %v189_v57, 1.0  ;;  %vm192_vm15 = vcmp.gt.f32.partialorder %v190_v58, 1.0 }
  0x51   :  { %v200_v59 = vsel %vm191_vm14, 0.0, %v189_v57  ;;  %v201_v60 = vsel %vm192_vm15, 0.0, %v190_v58  ;;  %v246_v61 = vsel %vm191_vm14, 1.0, %v250_v14  ;;  %v247_v62 = vsel %vm192_vm15, 1.0, %v250_v14 }
  0x52   :  { %202 = vst [vmem:[%s406_s4] sm:$0xff] %v200_v59  ;;  %v197_v63 = vpack.c.bf16 %v247_v62, %v246_v61 }
  0x53   :  { %203 = vst [vmem:[%s406_s4 + $0x8] sm:$0xff] %v201_v60 }
  0x54   :  { %248 = vst [vmem:[%s405_s3 + $0x38] sm:$0xff] %v197_v63 }

</bundles_post_ra>
